<compile_context>
chip_gen: v7x
topology: tpu7x:2x2x1
jax: 0.10.0
libtpu: 0.0.40
codegen_flags: <defaults>
</compile_context>

<pallas_src>
from functools import partial

import jax
import jax.numpy as jnp
from jax import lax
from jax.experimental import pallas as pl
from jax.experimental.pallas import tpu as pltpu


def trimap_kernel(trip_ref, w_ref, valid_ref, y_ref, loss_ref, viol_ref):
    t_tile = trip_ref.shape[0]
    n_rows = y_ref.shape[0]

    trip = trip_ref[...]            # (T_TILE, 3) int32
    w = w_ref[...]                  # (T_TILE, 1) f32 (0 on padded rows)
    valid = valid_ref[...]          # (T_TILE, 1) f32 (0 on padded rows)

    # Fused +/-1 coefficient matrix:
    #   rows [0, T)      -> onehot(anchor) - onehot(near)
    #   rows [T, 2T)     -> onehot(anchor) - onehot(far)
    idx_a = jnp.concatenate([trip[:, 0:1], trip[:, 0:1]], axis=0)       # (2T, 1)
    idx_b = jnp.concatenate([trip[:, 1:2], trip[:, 2:3]], axis=0)       # (2T, 1)
    iota_n = lax.broadcasted_iota(jnp.int32, (2 * t_tile, n_rows), 1)   # (2T, n)
    coeff = ((idx_a == iota_n).astype(jnp.float32)
             - (idx_b == iota_n).astype(jnp.float32))                   # (2T, n)

    # One MXU call does gather + subtract: [Y_i - Y_j ; Y_i - Y_k], lane-dense D.
    diffs = jnp.dot(coeff, y_ref[...], preferred_element_type=jnp.float32)  # (2T, Dp)
    sq = jnp.sum(diffs * diffs, axis=-1, keepdims=True)                     # (2T, 1)

    d_ij = 1.0 + sq[:t_tile, :]     # (T_TILE, 1)
    d_ik = 1.0 + sq[t_tile:, :]     # (T_TILE, 1)

    # Padded rows: d_ij == d_ik == 1 so the strict '>' is already False, but mask
    # explicitly with `valid` anyway.
    viol = jnp.sum(valid * (d_ij > d_ik).astype(jnp.float32))
    ratio = d_ij * pl.reciprocal(d_ij + d_ik, approx=True)   # divide on the EUP slot
    loss = jnp.sum(w * ratio)

    # Per-tile partials, broadcast over the whole (8,128) block so the store is a
    # full, unmasked vst.  The wrapper reads element [0, 0] of each block.
    loss_ref[...] = jnp.full(loss_ref.shape, loss, dtype=loss_ref.dtype)
    viol_ref[...] = jnp.full(viol_ref.shape, viol, dtype=viol_ref.dtype)


def _round_up(x, m):
    return ((x + m - 1) // m) * m


@partial(jax.jit, static_argnames=("t_tile",))
def trimap_forward(Y, triplets, weights, *, t_tile=128):
    n, d = Y.shape
    T = triplets.shape[0]

    n_pad = _round_up(n, 128)            # lane-dense coefficient matrix
    d_pad = _round_up(d, 128)            # lane-dense matmul output / squares
    t_pad = _round_up(max(T, 1), t_tile)
    num_tiles = t_pad // t_tile

    # Zero-padding: extra Y rows/cols are 0 (don't affect squared distances);
    # padded triplets point at row 0 with weight 0 / valid 0.
    Yp = jnp.zeros((n_pad, d_pad), jnp.float32).at[:n, :d].set(Y.astype(jnp.float32))
    trip = jnp.zeros((t_pad, 3), jnp.int32).at[:T, :].set(triplets.astype(jnp.int32))
    w = jnp.zeros((t_pad, 1), jnp.float32).at[:T, 0].set(weights.astype(jnp.float32))
    valid = jnp.zeros((t_pad, 1), jnp.float32).at[:T, 0].set(1.0)

    loss_part, viol_part = pl.pallas_call(
        trimap_kernel,
        out_shape=(
            jax.ShapeDtypeStruct((num_tiles * 8, 128), jnp.float32),
            jax.ShapeDtypeStruct((num_tiles * 8, 128), jnp.float32),
        ),
        grid_spec=pltpu.PrefetchScalarGridSpec(
            num_scalar_prefetch=0,
            grid=(num_tiles,),
            in_specs=[
                pl.BlockSpec((t_tile, 3), lambda i: (i, 0)),   # triplet tile (pipelined)
                pl.BlockSpec((t_tile, 1), lambda i: (i, 0)),   # weight tile
                pl.BlockSpec((t_tile, 1), lambda i: (i, 0)),   # valid-mask tile
                # Y: single resident VMEM copy, not tiled / not double-buffered.
                pl.BlockSpec(memory_space=pltpu.MemorySpace.VMEM),
            ],
            out_specs=(
                pl.BlockSpec((8, 128), lambda i: (i, 0)),      # per-tile loss partial
                pl.BlockSpec((8, 128), lambda i: (i, 0)),      # per-tile viol partial
            ),
        ),
        compiler_params=pltpu.CompilerParams(
            dimension_semantics=("parallel",),                 # megacore split on v7x
            vmem_limit_bytes=32 * 1024 * 1024,                 # safe on v5e/v6e/v7x
        ),
    )(trip, w, valid, Yp)

    loss = jnp.sum(loss_part[::8, 0])
    num_viol = jnp.sum(viol_part[::8, 0])
    return loss, num_viol


def trimap_reference(Y, triplets, weights):
    # Pure-JAX reference mirroring the PyTorch forward exactly.
    y_i = Y[triplets[:, 0]]
    y_j = Y[triplets[:, 1]]
    y_k = Y[triplets[:, 2]]
    d_ij = 1.0 + jnp.sum((y_i - y_j) ** 2, -1)
    d_ik = 1.0 + jnp.sum((y_i - y_k) ** 2, -1)
    num_viol = jnp.sum((d_ij > d_ik).astype(jnp.float32))
    loss = jnp.dot(weights, d_ij / (d_ij + d_ik))
    return loss, num_viol


if __name__ == "__main__":
    key = jax.random.PRNGKey(0)
    k_y, k_t, k_w = jax.random.split(key, 3)

    # out_shape = (n, num_dims); T triplets with weights (T not a tile multiple,
    # exercising padding + multi-step grid accumulation).
    n, num_dims = 64, 16
    T = 600

    # Embedding init matches the module's __init__: normal * 1e-4.
    Y = jax.random.normal(k_y, (n, num_dims), dtype=jnp.float32) * 1e-4
    triplets = jax.random.randint(k_t, (T, 3), 0, n, dtype=jnp.int32)
    weights = jax.random.uniform(k_w, (T,), dtype=jnp.float32)

    loss, num_viol = trimap_forward(Y, triplets, weights, t_tile=128)
    jax.block_until_ready((loss, num_viol))

    ref_loss, ref_viol = trimap_reference(Y, triplets, weights)
    # rtol relaxed to cover pl.reciprocal(approx=True) (~1e-4 relative).
    assert jnp.allclose(loss, ref_loss, rtol=2e-3, atol=1e-6), (loss, ref_loss)
    assert jnp.allclose(num_viol, ref_viol), (num_viol, ref_viol)

    print("KERNEL_OK")
</pallas_src>

<mosaic_0001>
module attributes {stable_mosaic.version = 11 : i64} {
  func.func @trimap_kernel(%arg0: i32, %arg1: memref<128x3xi32, #tpu.memory_space<vmem>>, %arg2: memref<128x1xf32, #tpu.memory_space<vmem>>, %arg3: memref<128x1xf32, #tpu.memory_space<vmem>>, %arg4: memref<128x128xf32, #tpu.memory_space<vmem>>, %arg5: memref<8x128xf32, #tpu.memory_space<vmem>>, %arg6: memref<8x128xf32, #tpu.memory_space<vmem>>) attributes {dimension_semantics = [#tpu.dimension_semantics<parallel>], iteration_bounds = array<i64: 5>, scalar_prefetch = 0 : i64, scratch_operands = 0 : i64, tpu.core_type = #tpu.core_type<tc>, window_params = [{transform_indices = @transform_0, window_bounds = array<i64: 128, 3>}, {transform_indices = @transform_1, window_bounds = array<i64: 128, 1>}, {transform_indices = @transform_2, window_bounds = array<i64: 128, 1>}, {pipeline_mode = #tpu.pipeline_mode<synchronous>, transform_indices = @transform_3, window_bounds = array<i64: 128, 128>}, {transform_indices = @transform_4, window_bounds = array<i64: 8, 128>}, {transform_indices = @transform_5, window_bounds = array<i64: 8, 128>}]} {
    %c0 = arith.constant 0 : index
    %c0_0 = arith.constant 0 : index
    %0 = vector.load %arg1[%c0, %c0_0] : memref<128x3xi32, #tpu.memory_space<vmem>>, vector<128x3xi32>
    %c0_1 = arith.constant 0 : index
    %c0_2 = arith.constant 0 : index
    %1 = vector.load %arg2[%c0_1, %c0_2] : memref<128x1xf32, #tpu.memory_space<vmem>>, vector<128x1xf32>
    %c0_3 = arith.constant 0 : index
    %c0_4 = arith.constant 0 : index
    %2 = vector.load %arg3[%c0_3, %c0_4] : memref<128x1xf32, #tpu.memory_space<vmem>>, vector<128x1xf32>
    %3 = vector.extract_strided_slice %0 {offsets = [0, 0], sizes = [128, 1], strides = [1, 1]} : vector<128x3xi32> to vector<128x1xi32>
    %4 = vector.extract_strided_slice %0 {offsets = [0, 0], sizes = [128, 1], strides = [1, 1]} : vector<128x3xi32> to vector<128x1xi32>
    %5 = tpu.concatenate %3, %4 in 0 : vector<128x1xi32>, vector<128x1xi32> -> vector<256x1xi32>
    %6 = vector.extract_strided_slice %0 {offsets = [0, 1], sizes = [128, 1], strides = [1, 1]} : vector<128x3xi32> to vector<128x1xi32>
    %7 = vector.extract_strided_slice %0 {offsets = [0, 2], sizes = [128, 1], strides = [1, 1]} : vector<128x3xi32> to vector<128x1xi32>
    %8 = tpu.concatenate %6, %7 in 0 : vector<128x1xi32>, vector<128x1xi32> -> vector<256x1xi32>
    %9 = tpu.iota {dimensions = array<i32: 1>} : vector<256x128xi32>
    %10 = vector.broadcast %5 : vector<256x1xi32> to vector<256x128xi32>
    %11 = arith.cmpi eq, %10, %9 : vector<256x128xi32>
    %12 = arith.extui %11 : vector<256x128xi1> to vector<256x128xi32>
    %13 = arith.sitofp %12 : vector<256x128xi32> to vector<256x128xf32>
    %14 = vector.broadcast %8 : vector<256x1xi32> to vector<256x128xi32>
    %15 = arith.cmpi eq, %14, %9 : vector<256x128xi32>
    %16 = arith.extui %15 : vector<256x128xi1> to vector<256x128xi32>
    %17 = arith.sitofp %16 : vector<256x128xi32> to vector<256x128xf32>
    %18 = arith.subf %13, %17 : vector<256x128xf32>
    %c0_5 = arith.constant 0 : index
    %c0_6 = arith.constant 0 : index
    %19 = vector.load %arg4[%c0_5, %c0_6] : memref<128x128xf32, #tpu.memory_space<vmem>>, vector<128x128xf32>
    %cst = arith.constant dense<0.000000e+00> : vector<256x128xf32>
    %20 = tpu.matmul %18, %19, %cst {dimension_numbers = #tpu.dot_dimension_numbers<[1], [0], [0], [1], [0, 0, 1, 1], [], []>} : vector<256x128xf32>, vector<128x128xf32>, vector<256x128xf32> -> vector<256x128xf32>
    %21 = arith.mulf %20, %20 : vector<256x128xf32>
    %cst_7 = arith.constant dense<0.000000e+00> : vector<256xf32>
    %22 = vector.multi_reduction <add>, %21, %cst_7 [1] : vector<256x128xf32> to vector<256xf32>
    %23 = vector.shape_cast %22 : vector<256xf32> to vector<256x1xf32>
    %24 = vector.extract_strided_slice %23 {offsets = [0, 0], sizes = [128, 1], strides = [1, 1]} : vector<256x1xf32> to vector<128x1xf32>
    %cst_8 = arith.constant 1.000000e+00 : f32
    %25 = vector.broadcast %cst_8 : f32 to vector<128x1xf32>
    %26 = arith.addf %25, %24 : vector<128x1xf32>
    %27 = vector.extract_strided_slice %23 {offsets = [128, 0], sizes = [128, 1], strides = [1, 1]} : vector<256x1xf32> to vector<128x1xf32>
    %cst_9 = arith.constant 1.000000e+00 : f32
    %28 = vector.broadcast %cst_9 : f32 to vector<128x1xf32>
    %29 = arith.addf %28, %27 : vector<128x1xf32>
    %30 = arith.cmpf ogt, %26, %29 : vector<128x1xf32>
    %31 = arith.extui %30 : vector<128x1xi1> to vector<128x1xi32>
    %32 = arith.sitofp %31 : vector<128x1xi32> to vector<128x1xf32>
    %33 = arith.mulf %2, %32 : vector<128x1xf32>
    %34 = vector.shape_cast %33 : vector<128x1xf32> to vector<1x128x1xf32>
    %cst_10 = arith.constant dense<0.000000e+00> : vector<1xf32>
    %35 = vector.multi_reduction <add>, %34, %cst_10 [1, 2] : vector<1x128x1xf32> to vector<1xf32>
    %36 = vector.shape_cast %35 : vector<1xf32> to vector<1x1x1xf32>
    %37 = vector.extract %36[0, 0, 0] : f32 from vector<1x1x1xf32>
    %38 = arith.addf %26, %29 : vector<128x1xf32>
    %39 = tpu.reciprocal %38 {approx = true} : vector<128x1xf32> -> vector<128x1xf32>
    %40 = arith.mulf %26, %39 : vector<128x1xf32>
    %41 = arith.mulf %1, %40 : vector<128x1xf32>
    %42 = vector.shape_cast %41 : vector<128x1xf32> to vector<1x128x1xf32>
    %cst_11 = arith.constant dense<0.000000e+00> : vector<1xf32>
    %43 = vector.multi_reduction <add>, %42, %cst_11 [1, 2] : vector<1x128x1xf32> to vector<1xf32>
    %44 = vector.shape_cast %43 : vector<1xf32> to vector<1x1x1xf32>
    %45 = vector.extract %44[0, 0, 0] : f32 from vector<1x1x1xf32>
    %46 = vector.broadcast %45 : f32 to vector<8x128xf32>
    %c0_12 = arith.constant 0 : index
    %c0_13 = arith.constant 0 : index
    %47 = vector.load %arg5[%c0_12, %c0_13] : memref<8x128xf32, #tpu.memory_space<vmem>>, vector<8x128xf32>
    tpu.vector_store %arg5[%c0_12, %c0_13], %46 {strides = array<i32>} : memref<8x128xf32, #tpu.memory_space<vmem>>, vector<8x128xf32>,
    %48 = vector.broadcast %37 : f32 to vector<8x128xf32>
    %c0_14 = arith.constant 0 : index
    %c0_15 = arith.constant 0 : index
    %49 = vector.load %arg6[%c0_14, %c0_15] : memref<8x128xf32, #tpu.memory_space<vmem>>, vector<8x128xf32>
    tpu.vector_store %arg6[%c0_14, %c0_15], %48 {strides = array<i32>} : memref<8x128xf32, #tpu.memory_space<vmem>>, vector<8x128xf32>,
    return
  }
  func.func @transform_0(%arg0: i32) -> (i32, i32) {
    %c0_i32 = arith.constant 0 : i32
    %c0_i32_0 = arith.constant 0 : i32
    return %arg0, %c0_i32 : i32, i32
  }
  func.func @transform_1(%arg0: i32) -> (i32, i32) {
    %c0_i32 = arith.constant 0 : i32
    %c0_i32_0 = arith.constant 0 : i32
    return %arg0, %c0_i32 : i32, i32
  }
  func.func @transform_2(%arg0: i32) -> (i32, i32) {
    %c0_i32 = arith.constant 0 : i32
    %c0_i32_0 = arith.constant 0 : i32
    return %arg0, %c0_i32 : i32, i32
  }
  func.func @transform_3(%arg0: i32) -> (i32, i32) {
    %c0_i32 = arith.constant 0 : i32
    %c0_i32_0 = arith.constant 0 : i32
    %c0_i32_1 = arith.constant 0 : i32
    return %c0_i32, %c0_i32_0 : i32, i32
  }
  func.func @transform_4(%arg0: i32) -> (i32, i32) {
    %c0_i32 = arith.constant 0 : i32
    %c0_i32_0 = arith.constant 0 : i32
    return %arg0, %c0_i32 : i32, i32
  }
  func.func @transform_5(%arg0: i32) -> (i32, i32) {
    %c0_i32 = arith.constant 0 : i32
    %c0_i32_0 = arith.constant 0 : i32
    return %arg0, %c0_i32 : i32, i32
  }
}

</mosaic_0001>

<bundles_post_ra>
// kernel: trimap_forward.1
= control target key start
LH: loop header
LB: loop body
LE: loop exit
PB: predicated region body
PF: predicated region fallthrough
CT: control target
= control target key end

     0   :  { %s1736_s18 = smov 0   ;;  %s2266_s0 = inlined_call_operand.vmem [shape: s32[640,3], index: 0, kind: input, shape index: {}]   ;;  %s2267_s1 = inlined_call_operand.vmem [shape: f32[640,1], index: 1, kind: input, shape index: {}]   ;;  %s2268_s2 = inlined_call_operand.vmem [shape: f32[640,1], index: 2, kind: input, shape index: {}]   ;;  %s2269_s3 = inlined_call_operand.vmem [shape: f32[128,128], index: 3, kind: input, shape index: {}]   ;;  %s2270_s4 = inlined_call_operand.vmem [shape: f32[40,128], index: 4, kind: output, shape index: {0}]   ;;  %s2271_s5 = inlined_call_operand.vmem [shape: f32[40,128], index: 5, kind: output, shape index: {1}]  }
   0x1 LB: > { %s1742_s19 = sadd.s32 4294967295, %s1700_s18   ;;  %p1376_p0 = scmp.ge.s32.totalorder %s1700_s18, 1  ;;  %s1700_s18 = sphi %s1736_s18, %s16_s18  }
   0x2   : > { %p213_p1 = scmp.lt.s32.totalorder %s1700_s18, 6 }
   0x4   : > { %p214_p2 = pnand %p1376_p0, %p213_p1 }
   0x5   : > { %s1377_s20 = sshll.u32 (!%p214_p2), %s1742_s19, 4  ;;  %v1702_v0 = vmov (!%p214_p2), 1   ;;  %v1703_v1 = vmov (!%p214_p2), 0   ;;  %s1704_s25 = smov (!%p214_p2), 127   ;;  %v682_v10 = vld [vmem:[%s2269_s3] sm:$0xff] (!%p214_p2)  ;;  %v683_v11 = vld [vmem:[%s2269_s3 + $0x8] sm:$0xff] (!%p214_p2)  ;;  %v360_v57 = vlaneseq (!%p214_p2) }
   0x6   : > { %217 = sbr.rel (%p214_p2) target bundleno = 912 (0x390), region = 36  ;;  %p255_p3 = scmp.lt.s32.totalorder (!%p214_p2), %s1377_s20, 79  ;;  %1644 = vset.pattern.permute.xlu1 (!%p214_p2), %v1702_v0  ;;  %1643 = vset.pattern.permute.xlu0 (!%p214_p2), %v1703_v1  ;;  %v1579_v12 = vpack.c.bf16 (!%p214_p2), %v683_v11, %v682_v10  ;;  %v684_v15 = vld [vmem:[%s2269_s3 + $0x10] sm:$0xff] (!%p214_p2)  ;;  %v685_v16 = vld [vmem:[%s2269_s3 + $0x18] sm:$0xff] (!%p214_p2)  ;;  %v686_v20 = vld [vmem:[%s2269_s3 + $0x20] sm:$0xff] (!%p214_p2)  ;;  %v1705_v62 = vmov (!%p214_p2), 0.0  }
   0x7   : > { %v1583_v17 = vpack.c.bf16 (!%p214_p2), %v685_v16, %v684_v15  ;;  %v687_v21 = vld [vmem:[%s2269_s3 + $0x28] sm:$0xff] (!%p214_p2)  ;;  %v688_v25 = vld [vmem:[%s2269_s3 + $0x30] sm:$0xff] (!%p214_p2)  ;;  %v689_v26 = vld [vmem:[%s2269_s3 + $0x38] sm:$0xff] (!%p214_p2)  ;;  %v1931_v59 = vand.u32 (!%p214_p2), 127, %v360_v57  ;;  %p272_p4 = scmp.lt.s32.totalorder (!%p214_p2), %s1742_s19, 4 }
   0x8   : > { %1580 = vmatprep.subr.bf16.mxu0 (!%p214_p2), %v1579_v12  ;;  %1611 = vmatprep.subr.bf16.mxu1 (!%p214_p2), %v1579_v12  ;;  %v1587_v22 = vpack.c.bf16 (!%p214_p2), %v687_v21, %v686_v20  ;;  %v1591_v27 = vpack.c.bf16 (!%p214_p2), %v689_v26, %v688_v25  ;;  %v690_v30 = vld [vmem:[%s2269_s3 + $0x40] sm:$0xff] (!%p214_p2)  ;;  %v691_v31 = vld [vmem:[%s2269_s3 + $0x48] sm:$0xff] (!%p214_p2)  ;;  %v692_v33 = vld [vmem:[%s2269_s3 + $0x50] sm:$0xff] (!%p214_p2) }
   0x9   : > { %1582 = vmatpush3.bf16.msra.mxu0 (!%p214_p2), %v1579_v12  ;;  %1619 = vmatpush3.bf16.msra.mxu1 (!%p214_p2), %v1579_v12  ;;  %v1595_v32 = vpack.c.bf16 (!%p214_p2), %v691_v31, %v690_v30  ;;  %v693_v34 = vld [vmem:[%s2269_s3 + $0x58] sm:$0xff] (!%p214_p2)  ;;  %v694_v36 = vld [vmem:[%s2269_s3 + $0x60] sm:$0xff] (!%p214_p2)  ;;  %v695_v37 = vld [vmem:[%s2269_s3 + $0x68] sm:$0xff] (!%p214_p2) }
   0xa   : > { %1584 = vmatprep.subr.bf16.mxu0 (!%p214_p2), %v1583_v17  ;;  %1612 = vmatprep.subr.bf16.mxu1 (!%p214_p2), %v1583_v17  ;;  %v1599_v35 = vpack.c.bf16 (!%p214_p2), %v693_v34, %v692_v33  ;;  %v1603_v38 = vpack.c.bf16 (!%p214_p2), %v695_v37, %v694_v36  ;;  %v696_v39 = vld [vmem:[%s2269_s3 + $0x70] sm:$0xff] (!%p214_p2)  ;;  %v697_v40 = vld [vmem:[%s2269_s3 + $0x78] sm:$0xff] (!%p214_p2) }
   0xb   : > { %v1607_v41 = vpack.c.bf16 (!%p214_p2), %v697_v40, %v696_v39 }
   0xd   : > { %s2273_s20 = smov (!%p255_p3, %s1377_s20), 79  ;;  %1586 = vmatpush3.bf16.msra.mxu0 %v1583_v17  ;;  %1620 = vmatpush3.bf16.msra.mxu1 %v1583_v17  ;;  %s2275_s19 = smov (!%p272_p4, %s1742_s19), 4 }
   0xe   : > { %s1749_s21 = sshll.u32 %s2273_s20, 3  ;;  %1588 = vmatprep.subr.bf16.mxu0 %v1587_v22  ;;  %1613 = vmatprep.subr.bf16.mxu1 %v1587_v22 }
   0xf   : > { %s1755_s24 = scalar_lea.vmem %s2266_s0, %s1749_s21  ;;  %s2096_s13 = scalar_lea.vmem %s2268_s2, %s1749_s21 }
  0x10   : > { %v1758_v2 = vld [vmem:[%s1755_s24 + $0x10] sm:$0xff]  ;;  %v1761_v3 = vld [vmem:[%s1755_s24] sm:$0xff]  ;;  %v1768_v4 = vld [vmem:[%s1755_s24 + $0x18] sm:$0xff]  ;;  %s2124_s16 = scalar_lea.vmem %s2267_s1, %s1749_s21  ;;  %s1383_s21 = sshll.u32 %s2275_s19, 3 }
  0x11   : > { %332 = vrot.lane.b32.xlu1 %v1758_v2, %s1704_s25  ;;  %328 = vrot.lane.b32.xlu0 %v1761_v3, %s1704_s25  ;;  %v1771_v5 = vld [vmem:[%s1755_s24 + $0x8] sm:$0xff]  ;;  %v1781_v7 = vld [vmem:[%s1755_s24 + $0x20] sm:$0xff]  ;;  %s279_s22 = scalar_lea.vmem %s2271_s5, %s1383_s21  ;;  %s275_s27 = scalar_lea.vmem %s2270_s4, %s1383_s21 }
  0x12   : > { %v1778_v6 = vld [vmem:[%s1755_s24 + $0x28] sm:$0xff]  ;;  %v1788_v8 = vld [vmem:[%s1755_s24 + $0x38] sm:$0xff]  ;;  %v1791_v9 = vld [vmem:[%s1755_s24 + $0x30] sm:$0xff]  ;;  %1590 = vmatpush3.bf16.msra.mxu0 %v1587_v22  ;;  %1621 = vmatpush3.bf16.msra.mxu1 %v1587_v22 }
  0x13   : > { %v1804_v13 = vld [vmem:[%s1755_s24 + $0x48] sm:$0xff]  ;;  %v1807_v14 = vld [vmem:[%s1755_s24 + $0x40] sm:$0xff]  ;;  %v1820_v18 = vld [vmem:[%s1755_s24 + $0x58] sm:$0xff]  ;;  %1592 = vmatprep.subr.bf16.mxu0 %v1591_v27  ;;  %1614 = vmatprep.subr.bf16.mxu1 %v1591_v27 }
  0x14   : > { %v1823_v19 = vld [vmem:[%s1755_s24 + $0x50] sm:$0xff]  ;;  %v1836_v23 = vld [vmem:[%s1755_s24 + $0x68] sm:$0xff]  ;;  %v1839_v24 = vld [vmem:[%s1755_s24 + $0x60] sm:$0xff] }
  0x15   : > { %334 = vrot.lane.b32.xlu1 %v1768_v4, %s1704_s25  ;;  %330 = vrot.lane.b32.xlu0 %v1771_v5, %s1704_s25  ;;  %v1852_v28 = vld [vmem:[%s1755_s24 + $0x78] sm:$0xff]  ;;  %v1855_v29 = vld [vmem:[%s1755_s24 + $0x70] sm:$0xff] }
  0x16   : > { %1594 = vmatpush3.bf16.msra.mxu0 %v1591_v27  ;;  %1622 = vmatpush3.bf16.msra.mxu1 %v1591_v27 }
  0x17   : > { %1596 = vmatprep.subr.bf16.mxu0 %v1595_v32  ;;  %1615 = vmatprep.subr.bf16.mxu1 %v1595_v32 }
  0x19   : > { %338 = vrot.lane.b32.xlu1 %v1778_v6, %s1704_s25  ;;  %336 = vrot.lane.b32.xlu0 %v1781_v7, %s1704_s25 }
  0x1a   : > { %1598 = vmatpush3.bf16.msra.mxu0 %v1595_v32  ;;  %1623 = vmatpush3.bf16.msra.mxu1 %v1595_v32 }
  0x1b   : > { %1600 = vmatprep.subr.bf16.mxu0 %v1599_v35  ;;  %1616 = vmatprep.subr.bf16.mxu1 %v1599_v35 }
  0x1d   : > { %342 = vrot.lane.b32.xlu1 %v1788_v8, %s1704_s25  ;;  %340 = vrot.lane.b32.xlu0 %v1791_v9, %s1704_s25 }
  0x1e   : > { %1602 = vmatpush3.bf16.msra.mxu0 %v1599_v35  ;;  %1624 = vmatpush3.bf16.msra.mxu1 %v1599_v35 }
  0x1f   : > { %1604 = vmatprep.subr.bf16.mxu0 %v1603_v38  ;;  %1617 = vmatprep.subr.bf16.mxu1 %v1603_v38 }
  0x21   : > { %346 = vrot.lane.b32.xlu1 %v1804_v13, %s1704_s25  ;;  %344 = vrot.lane.b32.xlu0 %v1807_v14, %s1704_s25 }
  0x22   : > { %1606 = vmatpush3.bf16.msra.mxu0 %v1603_v38  ;;  %1625 = vmatpush3.bf16.msra.mxu1 %v1603_v38 }
  0x23   : > { %1608 = vmatprep.subr.bf16.mxu0 %v1607_v41  ;;  %1618 = vmatprep.subr.bf16.mxu1 %v1607_v41 }
  0x25   : > { %350 = vrot.lane.b32.xlu1 %v1820_v18, %s1704_s25  ;;  %348 = vrot.lane.b32.xlu0 %v1823_v19, %s1704_s25 }
  0x26   : > { %1610 = vmatpush3.bf16.msra.mxu0 %v1607_v41  ;;  %1626 = vmatpush3.bf16.msra.mxu1 %v1607_v41 }
  0x29   : > { %354 = vrot.lane.b32.xlu1 %v1836_v23, %s1704_s25  ;;  %352 = vrot.lane.b32.xlu0 %v1839_v24, %s1704_s25 }
  0x2d   : > { %358 = vrot.lane.b32.xlu1 %v1852_v28, %s1704_s25  ;;  %356 = vrot.lane.b32.xlu0 %v1855_v29, %s1704_s25 }
  0x31   : > { %459 = vperm.xlu1 %1644, %v1761_v3   ;;  %363 = vperm.xlu0 %1643, %v1761_v3  }
  0x35   : > { %462 = vperm.xlu1 %1644, %v1771_v5   ;;  %366 = vperm.xlu0 %1643, %v1771_v5  }
  0x39   : > { %1645 = vset.pattern.permute.xlu1 %v1703_v1  ;;  %375 = vperm.xlu0 %1643, %v1781_v7  }
  0x3a   : > { %369 = vperm.xlu1 %1645, %v1758_v2  }
  0x3d   : > { %378 = vperm.xlu0 %1643, %v1778_v6  }
  0x3e   : > { %1646 = vset.pattern.permute.xlu1 %v1702_v0 }
  0x3f   : > { %465 = vperm.xlu1 %1646, %v1758_v2  }
  0x41   : > { %387 = vperm.xlu0 %1643, %v1807_v14  }
  0x43   : > { %1647 = vset.pattern.permute.xlu1 %v1703_v1 }
  0x44   : > { %372 = vperm.xlu1 %1647, %v1768_v4  }
  0x45   : > { %390 = vperm.xlu0 %1643, %v1804_v13  }
  0x48   : > { %1648 = vset.pattern.permute.xlu1 %v1702_v0 }
  0x49   : > { %471 = vperm.xlu1 %1648, %v1781_v7   ;;  %399 = vperm.xlu0 %1643, %v1839_v24  }
  0x4d   : > { %474 = vperm.xlu1 %1648, %v1778_v6   ;;  %402 = vperm.xlu0 %1643, %v1836_v23  }
  0x51   : > { %1649 = vset.pattern.permute.xlu1 %v1703_v1  ;;  %1657 = vset.pattern.permute.xlu0 %v1702_v0 }
  0x52   : > { %381 = vperm.xlu1 %1649, %v1791_v9   ;;  %468 = vperm.xlu0 %1657, %v1768_v4  }
  0x56   : > { %1650 = vset.pattern.permute.xlu1 %v1702_v0  ;;  %480 = vperm.xlu0 %1657, %v1788_v8  }
  0x57   : > { %477 = vperm.xlu1 %1650, %v1791_v9  }
  0x5b   : > { %1651 = vset.pattern.permute.xlu1 %v1703_v1 }
  0x5c   : > { %384 = vperm.xlu1 %1651, %v1788_v8  }
  0x60   : > { %1652 = vset.pattern.permute.xlu1 %v1702_v0 }
  0x61   : > { %483 = vperm.xlu1 %1652, %v1807_v14  }
  0x65   : > { %486 = vperm.xlu1 %1652, %v1804_v13  }
  0x69   : > { %1653 = vset.pattern.permute.xlu1 %v1703_v1 }
  0x6a   : > { %393 = vperm.xlu1 %1653, %v1823_v19  }
  0x6e   : > { %1654 = vset.pattern.permute.xlu1 %v1702_v0 }
  0x6f   : > { %489 = vperm.xlu1 %1654, %v1823_v19  }
  0x73   : > { %1655 = vset.pattern.permute.xlu1 %v1703_v1 }
  0x74   : > { %396 = vperm.xlu1 %1655, %v1820_v18  }
  0x78   : > { %1656 = vset.pattern.permute.xlu1 %v1702_v0 }
  0x79   : > { %495 = vperm.xlu1 %1656, %v1839_v24  }
  0x83   : > { %v333_v42 = vpop.permute.xlu1 %332  ;;  %v329_v43 = vpop.permute.xlu0 %328 }
  0x84   : > { %507 = vperm.xlu1 %1656, %v329_v43  }
  0x87   : > { %v335_v44 = vpop.permute.xlu1 %334  ;;  %v331_v45 = vpop.permute.xlu0 %330 }
  0x88   : > { %516 = vperm.xlu1 %1656, %v335_v44   ;;  %510 = vperm.xlu0 %1657, %v331_v45  }
  0x8b   : > { %v339_v46 = vpop.permute.xlu1 %338  ;;  %v337_v47 = vpop.permute.xlu0 %336 }
  0x8c   : > { %513 = vperm.xlu0 %1657, %v333_v42   ;;  %519 = vperm.xlu1 %1656, %v337_v47  }
  0x8f   : > { %v343_v48 = vpop.permute.xlu1 %342  ;;  %v341_v49 = vpop.permute.xlu0 %340 }
  0x90   : > { %522 = vperm.xlu0 %1657, %v339_v46   ;;  %528 = vperm.xlu1 %1656, %v343_v48  }
  0x93   : > { %v347_v50 = vpop.permute.xlu1 %346  ;;  %v345_v51 = vpop.permute.xlu0 %344 }
  0x94   : > { %525 = vperm.xlu0 %1657, %v341_v49   ;;  %531 = vperm.xlu1 %1656, %v345_v51  }
  0x97   : > { %v351_v52 = vpop.permute.xlu1 %350  ;;  %v349_v53 = vpop.permute.xlu0 %348 }
  0x98   : > { %534 = vperm.xlu0 %1657, %v347_v50   ;;  %540 = vperm.xlu1 %1656, %v351_v52  }
  0x9b   : > { %v353_v54 = vpop.permute.xlu0 %352  ;;  %v355_v55 = vpop.permute.xlu1 %354 }
  0x9c   : > { %537 = vperm.xlu0 %1657, %v349_v53   ;;  %543 = vperm.xlu1 %1656, %v353_v54  }
  0x9f   : > { %v357_v56 = vpop.permute.xlu0 %356  ;;  %v359_v58 = vpop.permute.xlu1 %358 }
  0xa0   : > { %492 = vperm.xlu0 %1657, %v1820_v18   ;;  %498 = vperm.xlu1 %1656, %v1836_v23  }
  0xa4   : > { %546 = vperm.xlu0 %1657, %v355_v55   ;;  %1658 = vset.pattern.permute.xlu1 %v1703_v1 }
  0xa5   : > { %405 = vperm.xlu1 %1658, %v1855_v29  }
  0xa8   : > { %549 = vperm.xlu0 %1657, %v357_v56  }
  0xa9   : > { %1659 = vset.pattern.permute.xlu1 %v1702_v0 }
  0xaa   : > { %501 = vperm.xlu1 %1659, %v1855_v29  }
  0xac   : > { %504 = vperm.xlu0 %1657, %v1852_v28  }
  0xae   : > { %1660 = vset.pattern.permute.xlu1 %v1703_v1 }
  0xaf   : > { %408 = vperm.xlu1 %1660, %v1852_v28  }
  0xb0   : > { %v364_v60 = vpop.permute.xlu0 %363  ;;  %v460_v61 = vpop.permute.xlu1 %459 }
  0xb1   : > { %vm410_vm0 = vcmp.eq.s32.totalorder %v364_v60, %v1931_v59  ;;  %vm554_vm1 = vcmp.eq.s32.totalorder %v460_v61, %v1931_v59 }
  0xb2   : > { %v1938_v63 = vsel %vm410_vm0, 1.0, %v1705_v62  ;;  %v1401_v2 = vsel %vm554_vm1, 1.0, %v1705_v62 }
  0xb3   : > { %1661 = vset.pattern.permute.xlu1 %v1702_v0  ;;  %v650_v3 = vsub.f32 %v1938_v63, %v1401_v2 }
  0xb4   : > { %552 = vperm.xlu1 %1661, %v359_v58   ;;  %v367_v1 = vpop.permute.xlu0 %366  ;;  %v463_v4 = vpop.permute.xlu1 %462 }
  0xb5   : > { %vm411_vm2 = vcmp.eq.s32.totalorder %v367_v1, %v1931_v59  ;;  %vm555_vm3 = vcmp.eq.s32.totalorder %v463_v4, %v1931_v59  ;;  %1531 = vmatprep.mubr.f32.mxu0 %v650_v3 }
  0xb6   : > { %v1946_v5 = vsel %vm411_vm2, 1.0, %v1705_v62  ;;  %v1402_v6 = vsel %vm555_vm3, 1.0, %v1705_v62 }
  0xb7   : > { %v651_v7 = vsub.f32 %v1946_v5, %v1402_v6 }
  0xb8   : > { %v376_v8 = vpop.permute.xlu0 %375 }
  0xb9   : > { %1532 = vmatmul.mubr.f32.vlgmr.msra.gmra.mrb[0].mxu0 %v651_v7  ;;  %v370_v0 = vpop.permute.xlu1 %369  ;;  %vm414_vm6 = vcmp.eq.s32.totalorder %v376_v8, %v1931_v59 }
  0xba   : > { %vm412_vm4 = vcmp.eq.s32.totalorder %v370_v0, %v1931_v59  ;;  %v1964_v21 = vsel %vm414_vm6, 1.0, %v1705_v62 }
  0xbb   : > { %v1952_v10 = vsel %vm412_vm4, 1.0, %v1705_v62 }
  0xbc   : > { %v379_v9 = vpop.permute.xlu0 %378 }
  0xbd   : > { %vm415_vm9 = vcmp.eq.s32.totalorder %v379_v9, %v1931_v59 }
  0xbe   : > { %v466_v11 = vpop.permute.xlu1 %465  ;;  %v1979_v29 = vsel %vm415_vm9, 1.0, %v1705_v62 }
  0xbf   : > { %vm556_vm5 = vcmp.eq.s32.totalorder %v466_v11, %v1931_v59 }
  0xc0   : > { %v388_v12 = vpop.permute.xlu0 %387  ;;  %v1403_v13 = vsel %vm556_vm5, 1.0, %v1705_v62 }
  0xc1   : > { %v652_v14 = vsub.f32 %v1952_v10, %v1403_v13  ;;  %vm418_vm0 = vcmp.eq.s32.totalorder %v388_v12, %v1931_v59 }
  0xc2   : > { %v1999_v42 = vsel %vm418_vm0, 1.0, %v1705_v62 }
  0xc3   : > { %v373_v15 = vpop.permute.xlu1 %372  ;;  %1534 = vmatprep.mubr.f32.mxu0 %v652_v14 }
  0xc4   : > { %v391_v16 = vpop.permute.xlu0 %390  ;;  %vm413_vm8 = vcmp.eq.s32.totalorder %v373_v15, %v1931_v59 }
  0xc5   : > { %v1972_v25 = vsel %vm413_vm8, 1.0, %v1705_v62  ;;  %vm419_vm2 = vcmp.eq.s32.totalorder %v391_v16, %v1931_v59 }
  0xc6   : > { %v2006_v46 = vsel %vm419_vm2, 1.0, %v1705_v62 }
  0xc8   : > { %v1957_v17 = vpop.permute.xlu0 %399  ;;  %v472_v18 = vpop.permute.xlu1 %471 }
  0xc9   : > { %vm558_vm7 = vcmp.eq.s32.totalorder %v472_v18, %v1931_v59  ;;  %vm422_vm2 = vcmp.eq.s32.totalorder %v1957_v17, %v1931_v59 }
  0xca   : > { %v1405_v22 = vsel %vm558_vm7, 1.0, %v1705_v62  ;;  %v1397_v17 = vsel %vm422_vm2, 1.0, %v1705_v62 }
  0xcb   : > { %v654_v26 = vsub.f32 %v1964_v21, %v1405_v22 }
  0xcc   : > { %v1959_v19 = vpop.permute.xlu0 %402  ;;  %v475_v20 = vpop.permute.xlu1 %474 }
  0xcd   : > { %vm559_vm10 = vcmp.eq.s32.totalorder %v475_v20, %v1931_v59 }
  0xce   : > { %v1406_v30 = vsel %vm559_vm10, 1.0, %v1705_v62 }
  0xcf   : > { %v655_v34 = vsub.f32 %v1979_v29, %v1406_v30 }
  0xd1   : > { %v469_v23 = vpop.permute.xlu0 %468  ;;  %v382_v24 = vpop.permute.xlu1 %381 }
  0xd2   : > { %vm557_vm11 = vcmp.eq.s32.totalorder %v469_v23, %v1931_v59  ;;  %vm416_vm12 = vcmp.eq.s32.totalorder %v382_v24, %v1931_v59 }
  0xd3   : > { %v1404_v27 = vsel %vm557_vm11, 1.0, %v1705_v62  ;;  %v1983_v32 = vsel %vm416_vm12, 1.0, %v1705_v62 }
  0xd4   : > { %v653_v28 = vsub.f32 %v1972_v25, %v1404_v27 }
  0xd5   : > { %v481_v31 = vpop.permute.xlu0 %480 }
  0xd6   : > { %1535 = vmatmul.mubr.f32.gmra.mrb[2].mxu0 %v653_v28  ;;  %v478_v33 = vpop.permute.xlu1 %477  ;;  %vm561_vm14 = vcmp.eq.s32.totalorder %v481_v31, %v1931_v59 }
  0xd7   : > { %1537 = vmatprep.mubr.f32.mxu0 %v654_v26  ;;  %vm560_vm13 = vcmp.eq.s32.totalorder %v478_v33, %v1931_v59  ;;  %v1408_v38 = vsel %vm561_vm14, 1.0, %v1705_v62 }
  0xd8   : > { %v1407_v35 = vsel %vm560_vm13, 1.0, %v1705_v62 }
  0xd9   : > { %v656_v36 = vsub.f32 %v1983_v32, %v1407_v35 }
  0xda   : > { %1538 = vmatmul.mubr.f32.gmra.mrb[4].mxu0 %v655_v34 }
  0xdb   : > { %v385_v37 = vpop.permute.xlu1 %384  ;;  %1540 = vmatprep.mubr.f32.mxu0 %v656_v36 }
  0xdc   : > { %vm417_vm15 = vcmp.eq.s32.totalorder %v385_v37, %v1931_v59 }
  0xdd   : > { %v1993_v39 = vsel %vm417_vm15, 1.0, %v1705_v62 }
  0xde   : > { %v657_v40 = vsub.f32 %v1993_v39, %v1408_v38 }
  0xe0   : > { %v484_v41 = vpop.permute.xlu1 %483  ;;  %1541 = vmatmul.mubr.f32.gmra.mrb[6].mxu0 %v657_v40 }
  0xe1   : > { %vm562_vm1 = vcmp.eq.s32.totalorder %v484_v41, %v1931_v59 }
  0xe2   : > { %v1409_v43 = vsel %vm562_vm1, 1.0, %v1705_v62 }
  0xe3   : > { %v658_v44 = vsub.f32 %v1999_v42, %v1409_v43 }
  0xe4   : > { %v487_v45 = vpop.permute.xlu1 %486 }
  0xe5   : > { %vm563_vm3 = vcmp.eq.s32.totalorder %v487_v45, %v1931_v59  ;;  %1543 = vmatprep.mubr.f32.mxu0 %v658_v44 }
  0xe6   : > { %v1410_v47 = vsel %vm563_vm3, 1.0, %v1705_v62 }
  0xe7   : > { %v659_v48 = vsub.f32 %v2006_v46, %v1410_v47 }
  0xe9   : > { %1544 = vmatmul.mubr.f32.gmra.mrb[8].mxu0 %v659_v48  ;;  %v394_v49 = vpop.permute.xlu1 %393 }
  0xea   : > { %vm420_vm4 = vcmp.eq.s32.totalorder %v394_v49, %v1931_v59 }
  0xeb   : > { %v2012_v50 = vsel %vm420_vm4, 1.0, %v1705_v62 }
  0xee   : > { %v490_v51 = vpop.permute.xlu1 %489 }
  0xef   : > { %vm564_vm5 = vcmp.eq.s32.totalorder %v490_v51, %v1931_v59 }
  0xf0   : > { %v1411_v52 = vsel %vm564_vm5, 1.0, %v1705_v62 }
  0xf1   : > { %v660_v53 = vsub.f32 %v2012_v50, %v1411_v52 }
  0xf3   : > { %1546 = vmatprep.mubr.f32.mxu0 %v660_v53  ;;  %v2017_v54 = vpop.permute.xlu1 %396 }
  0xf4   : > { %vm421_vm1 = vcmp.eq.s32.totalorder %v2017_v54, %v1931_v59 }
  0xf8   : > { %v2019_v55 = vpop.permute.xlu1 %495 }
  0xf9   : > { %vm566_vm5 = vcmp.eq.s32.totalorder %v2019_v55, %v1931_v59 }
  0xfa   : > { %v1413_v37 = vsel %vm566_vm5, 1.0, %v1705_v62 }
  0xfb   : > { %v662_v41 = vsub.f32 %v1397_v17, %v1413_v37 }
 0x103   : > { %v508_v56 = vpop.permute.xlu1 %507 }
 0x104   : > { %vm570_vm6 = vcmp.eq.s32.totalorder %v508_v56, %v1931_v59 }
 0x105   : > { %v1417_v57 = vsel %vm570_vm6, 1.0, %v1705_v62 }
 0x106   : > { %v666_v58 = vsub.f32 %v1938_v63, %v1417_v57 }
 0x107   : > { %v517_v60 = vpop.permute.xlu1 %516  ;;  %v511_v61 = vpop.permute.xlu0 %510 }
 0x108   : > { %vm571_vm7 = vcmp.eq.s32.totalorder %v511_v61, %v1931_v59  ;;  %1555 = vmatprep.mubr.f32.mxu1 %v666_v58  ;;  %vm573_vm8 = vcmp.eq.s32.totalorder %v517_v60, %v1931_v59 }
 0x109   : > { %v1418_v2 = vsel %vm571_vm7, 1.0, %v1705_v62  ;;  %v1420_v6 = vsel %vm573_vm8, 1.0, %v1705_v62  ;;  %vm423_vm8 = vcmp.eq.s32.totalorder %v1959_v19, %v1931_v59 }
 0x10a   : > { %v667_v3 = vsub.f32 %v1946_v5, %v1418_v2  ;;  %v669_v0 = vsub.f32 %v1972_v25, %v1420_v6  ;;  %v1398_v45 = vsel %vm423_vm8, 1.0, %v1705_v62 }
 0x10b   : > { %v520_v1 = vpop.permute.xlu1 %519  ;;  %v514_v4 = vpop.permute.xlu0 %513 }
 0x10c   : > { %vm574_vm9 = vcmp.eq.s32.totalorder %v520_v1, %v1931_v59  ;;  %vm572_vm10 = vcmp.eq.s32.totalorder %v514_v4, %v1931_v59  ;;  %1556 = vmatmul.mubr.f32.vlgmr.msra.gmra.mrb[0].mxu1 %v667_v3 }
 0x10d   : > { %v1421_v63 = vsel %vm574_vm9, 1.0, %v1705_v62  ;;  %v1419_v7 = vsel %vm572_vm10, 1.0, %v1705_v62 }
 0x10e   : > { %v668_v8 = vsub.f32 %v1952_v10, %v1419_v7  ;;  %v670_v5 = vsub.f32 %v1964_v21, %v1421_v63 }
 0x10f   : > { %v529_v9 = vpop.permute.xlu1 %528  ;;  %v523_v11 = vpop.permute.xlu0 %522 }
 0x110   : > { %vm575_vm11 = vcmp.eq.s32.totalorder %v523_v11, %v1931_v59  ;;  %1558 = vmatprep.mubr.f32.mxu1 %v668_v8  ;;  %vm577_vm12 = vcmp.eq.s32.totalorder %v529_v9, %v1931_v59 }
 0x111   : > { %v1422_v12 = vsel %vm575_vm11, 1.0, %v1705_v62  ;;  %1559 = vmatmul.mubr.f32.gmra.mrb[2].mxu1 %v669_v0  ;;  %v1424_v10 = vsel %vm577_vm12, 1.0, %v1705_v62 }
 0x112   : > { %v671_v13 = vsub.f32 %v1979_v29, %v1422_v12  ;;  %1561 = vmatprep.mubr.f32.mxu1 %v670_v5  ;;  %v673_v21 = vsub.f32 %v1993_v39, %v1424_v10 }
 0x113   : > { %v532_v14 = vpop.permute.xlu1 %531  ;;  %v526_v15 = vpop.permute.xlu0 %525 }
 0x114   : > { %vm578_vm13 = vcmp.eq.s32.totalorder %v532_v14, %v1931_v59  ;;  %vm576_vm14 = vcmp.eq.s32.totalorder %v526_v15, %v1931_v59 }
 0x115   : > { %v1425_v16 = vsel %vm578_vm13, 1.0, %v1705_v62  ;;  %v1423_v18 = vsel %vm576_vm14, 1.0, %v1705_v62  ;;  %1562 = vmatmul.mubr.f32.gmra.mrb[4].mxu1 %v671_v13 }
 0x116   : > { %v672_v20 = vsub.f32 %v1983_v32, %v1423_v18  ;;  %v674_v24 = vsub.f32 %v1999_v42, %v1425_v16  ;;  %v1396_v32 = vsel %vm421_vm1, 1.0, %v1705_v62 }
 0x117   : > { %v541_v22 = vpop.permute.xlu1 %540  ;;  %v535_v23 = vpop.permute.xlu0 %534 }
 0x118   : > { %vm579_vm15 = vcmp.eq.s32.totalorder %v535_v23, %v1931_v59  ;;  %1564 = vmatprep.mubr.f32.mxu1 %v672_v20  ;;  %vm581_vm0 = vcmp.eq.s32.totalorder %v541_v22, %v1931_v59 }
 0x119   : > { %v1426_v25 = vsel %vm579_vm15, 1.0, %v1705_v62  ;;  %1565 = vmatmul.mubr.f32.gmra.mrb[6].mxu1 %v673_v21  ;;  %v1428_v29 = vsel %vm581_vm0, 1.0, %v1705_v62 }
 0x11a   : > { %v675_v26 = vsub.f32 %v2006_v46, %v1426_v25  ;;  %1567 = vmatprep.mubr.f32.mxu1 %v674_v24  ;;  %v677_v34 = vsub.f32 %v1396_v32, %v1428_v29 }
 0x11b   : > { %v544_v27 = vpop.permute.xlu1 %543  ;;  %v538_v28 = vpop.permute.xlu0 %537 }
 0x11c   : > { %vm582_vm3 = vcmp.eq.s32.totalorder %v544_v27, %v1931_v59  ;;  %vm580_vm4 = vcmp.eq.s32.totalorder %v538_v28, %v1931_v59 }
 0x11d   : > { %v1429_v30 = vsel %vm582_vm3, 1.0, %v1705_v62  ;;  %v1427_v31 = vsel %vm580_vm4, 1.0, %v1705_v62  ;;  %1568 = vmatmul.mubr.f32.gmra.mrb[8].mxu1 %v675_v26  ;;  %vm1115_vm3 = vcmask 7168  }
 0x11e   : > { %v676_v33 = vsub.f32 %v2012_v50, %v1427_v31  ;;  %v678_v38 = vsub.f32 %v1397_v17, %v1429_v30 }
 0x11f   : > { %v499_v35 = vpop.permute.xlu1 %498  ;;  %v493_v36 = vpop.permute.xlu0 %492 }
 0x120   : > { %vm567_vm6 = vcmp.eq.s32.totalorder %v499_v35, %v1931_v59  ;;  %vm565_vm7 = vcmp.eq.s32.totalorder %v493_v36, %v1931_v59  ;;  %1570 = vmatprep.mubr.f32.mxu1 %v676_v33 }
 0x121   : > { %v1412_v39 = vsel %vm565_vm7, 1.0, %v1705_v62  ;;  %1571 = vmatmul.mubr.f32.gmra.mrb[10].mxu1 %v677_v34  ;;  %v1414_v42 = vsel %vm567_vm6, 1.0, %v1705_v62 }
 0x122   : > { %v661_v40 = vsub.f32 %v1396_v32, %v1412_v39  ;;  %1573 = vmatprep.mubr.f32.mxu1 %v678_v38  ;;  %v663_v47 = vsub.f32 %v1398_v45, %v1414_v42 }
 0x123   : > { %v547_v43 = vpop.permute.xlu0 %546 }
 0x124   : > { %vm583_vm9 = vcmp.eq.s32.totalorder %v547_v43, %v1931_v59  ;;  %1547 = vmatmul.mubr.f32.gmra.mrb[10].mxu0 %v661_v40  ;;  %v406_v44 = vpop.permute.xlu1 %405 }
 0x125   : > { %v1430_v46 = vsel %vm583_vm9, 1.0, %v1705_v62  ;;  %1549 = vmatprep.mubr.f32.mxu0 %v662_v41  ;;  %vm424_vm10 = vcmp.eq.s32.totalorder %v406_v44, %v1931_v59 }
 0x126   : > { %v679_v48 = vsub.f32 %v1398_v45, %v1430_v46  ;;  %v1399_v19 = vsel %vm424_vm10, 1.0, %v1705_v62 }
 0x127   : > { %v550_v49 = vpop.permute.xlu0 %549 }
 0x128   : > { %vm584_vm11 = vcmp.eq.s32.totalorder %v550_v49, %v1931_v59  ;;  %1550 = vmatmul.mubr.f32.gmra.mrb[12].mxu0 %v663_v47  ;;  %1574 = vmatmul.mubr.f32.gmra.mrb[12].mxu1 %v679_v48 }
 0x129   : > { %v1431_v50 = vsel %vm584_vm11, 1.0, %v1705_v62  ;;  %v502_v51 = vpop.permute.xlu1 %501 }
 0x12a   : > { %v680_v52 = vsub.f32 %v1399_v19, %v1431_v50  ;;  %vm568_vm12 = vcmp.eq.s32.totalorder %v502_v51, %v1931_v59 }
 0x12b   : > { %v1415_v53 = vsel %vm568_vm12, 1.0, %v1705_v62  ;;  %v505_v54 = vpop.permute.xlu0 %504 }
 0x12c   : > { %v664_v55 = vsub.f32 %v1399_v19, %v1415_v53  ;;  %1576 = vmatprep.mubr.f32.mxu1 %v680_v52  ;;  %vm569_vm13 = vcmp.eq.s32.totalorder %v505_v54, %v1931_v59 }
 0x12d   : > { %v1416_v57 = vsel %vm569_vm13, 1.0, %v1705_v62 }
 0x12e   : > { %v409_v56 = vpop.permute.xlu1 %408  ;;  %1552 = vmatprep.mubr.f32.mxu0 %v664_v55 }
 0x12f   : > { %vm425_vm14 = vcmp.eq.s32.totalorder %v409_v56, %v1931_v59 }
 0x130   : > { %v1400_v58 = vsel %vm425_vm14, 1.0, %v1705_v62 }
 0x131   : > { %v665_v60 = vsub.f32 %v1400_v58, %v1416_v57 }
 0x133   : > { %v553_v61 = vpop.permute.xlu1 %552  ;;  %1553 = vmatmul.mubr.f32.gmra.mrb[14].mxu0 %v665_v60 }
 0x134   : > { %vm585_vm15 = vcmp.eq.s32.totalorder %v553_v61, %v1931_v59 }
 0x135   : > { %v1432_v2 = vsel %vm585_vm15, 1.0, %v1705_v62 }
 0x136   : > { %v681_v3 = vsub.f32 %v1400_v58, %v1432_v2 }
 0x138   : > { %1577 = vmatmul.mubr.f32.gmra.mrb[14].mxu1 %v681_v3 }
 0x18c   : > { %v1533_v1 = vpop.f32.mrb[0].mxu0 }
 0x18d   : > { %v924_v4 = vmul.f32 %v1533_v1, %v1533_v1  ;;  %v764_v6 = vpop.f32.mrb[1].mxu0 }
 0x18e   : > { %v923_v63 = vmul.f32 %v764_v6, %v764_v6 }
 0x18f   : > { %957 = vadd.xlane.f32.xlu1 %v924_v4 }
 0x190   : > { %955 = vadd.xlane.f32.xlu0 %v923_v63 }
 0x1a9   : > { %v1536_v7 = vpop.f32.mrb[2].mxu0 }
 0x1aa   : > { %v926_v8 = vmul.f32 %v1536_v7, %v1536_v7  ;;  %v774_v0 = vpop.f32.mrb[3].mxu0 }
 0x1ab   : > { %v925_v11 = vmul.f32 %v774_v0, %v774_v0 }
 0x1ac   : > { %961 = vadd.xlane.f32.xlu1 %v926_v8 }
 0x1ad   : > { %v1539_v9 = vpop.f32.mrb[4].mxu0 }
 0x1ae   : > { %v784_v5 = vpop.f32.mrb[5].mxu0  ;;  %v928_v12 = vmul.f32 %v1539_v9, %v1539_v9 }
 0x1af   : > { %v927_v14 = vmul.f32 %v784_v5, %v784_v5 }
 0x1b0   : > { %959 = vadd.xlane.f32.xlu1 %v925_v11 }
 0x1b3   : > { %v1542_v59 = vpop.f32.mrb[6].mxu0 }
 0x1b4   : > { %965 = vadd.xlane.f32.xlu1 %v928_v12  ;;  %v794_v13 = vpop.f32.mrb[7].mxu0  ;;  %v930_v15 = vmul.f32 %v1542_v59, %v1542_v59 }
 0x1b5   : > { %v929_v10 = vmul.f32 %v794_v13, %v794_v13 }
 0x1b8   : > { %963 = vadd.xlane.f32.xlu1 %v927_v14 }
 0x1bc   : > { %969 = vadd.xlane.f32.xlu1 %v930_v15  ;;  %v1545_v16 = vpop.f32.mrb[8].mxu0 }
 0x1bd   : > { %v804_v18 = vpop.f32.mrb[9].mxu0  ;;  %v932_v20 = vmul.f32 %v1545_v16, %v1545_v16 }
 0x1be   : > { %v931_v21 = vmul.f32 %v804_v18, %v804_v18 }
 0x1c0   : > { %967 = vadd.xlane.f32.xlu1 %v929_v10 }
 0x1c4   : > { %973 = vadd.xlane.f32.xlu1 %v932_v20 }
 0x1c8   : > { %971 = vadd.xlane.f32.xlu1 %v931_v21 }
 0x1df   : > { %v1557_v22 = vpop.f32.mrb[0].mxu1 }
 0x1e0   : > { %v940_v23 = vmul.f32 %v1557_v22, %v1557_v22  ;;  %v844_v24 = vpop.f32.mrb[1].mxu1 }
 0x1e1   : > { %v939_v25 = vmul.f32 %v844_v24, %v844_v24 }
 0x1e2   : > { %989 = vadd.xlane.f32.xlu0 %v940_v23 }
 0x1e4   : > { %v1560_v26 = vpop.f32.mrb[2].mxu1 }
 0x1e5   : > { %v854_v27 = vpop.f32.mrb[3].mxu1  ;;  %v942_v28 = vmul.f32 %v1560_v26, %v1560_v26 }
 0x1e6   : > { %987 = vadd.xlane.f32.xlu0 %v939_v25  ;;  %v941_v31 = vmul.f32 %v854_v27, %v854_v27 }
 0x1e8   : > { %v1563_v29 = vpop.f32.mrb[4].mxu1 }
 0x1e9   : > { %v864_v30 = vpop.f32.mrb[5].mxu1  ;;  %v944_v17 = vmul.f32 %v1563_v29, %v1563_v29  ;;  %v312_v29 = vld [vmem:[%s2096_s13] sm:$0xff] }
 0x1ea   : > { %993 = vadd.xlane.f32.xlu0 %v942_v28  ;;  %v943_v36 = vmul.f32 %v864_v30, %v864_v30 }
 0x1ec   : > { %v1566_v32 = vpop.f32.mrb[6].mxu1 }
 0x1ed   : > { %v874_v33 = vpop.f32.mrb[7].mxu1  ;;  %v946_v40 = vmul.f32 %v1566_v32, %v1566_v32 }
 0x1ee   : > { %991 = vadd.xlane.f32.xlu0 %v941_v31  ;;  %v945_v45 = vmul.f32 %v874_v33, %v874_v33  ;;  %v313_v31 = vld [vmem:[%s2096_s13 + $0x8] sm:$0xff] }
 0x1f0   : > { %v1569_v34 = vpop.f32.mrb[8].mxu1 }
 0x1f1   : > { %v884_v35 = vpop.f32.mrb[9].mxu1  ;;  %v948_v19 = vmul.f32 %v1569_v34, %v1569_v34 }
 0x1f2   : > { %997 = vadd.xlane.f32.xlu0 %v944_v17  ;;  %v947_v50 = vmul.f32 %v884_v35, %v884_v35  ;;  %v314_v17 = vld [vmem:[%s2096_s13 + $0x10] sm:$0xff] }
 0x1f4   : > { %v1572_v37 = vpop.f32.mrb[10].mxu1 }
 0x1f5   : > { %v894_v38 = vpop.f32.mrb[11].mxu1  ;;  %v950_v54 = vmul.f32 %v1572_v37, %v1572_v37 }
 0x1f6   : > { %995 = vadd.xlane.f32.xlu0 %v943_v36  ;;  %v949_v57 = vmul.f32 %v894_v38, %v894_v38 }
 0x1f7   : > { %v1548_v39 = vpop.f32.mrb[10].mxu0 }
 0x1f8   : > { %v934_v41 = vmul.f32 %v1548_v39, %v1548_v39  ;;  %v814_v42 = vpop.f32.mrb[11].mxu0 }
 0x1f9   : > { %v933_v46 = vmul.f32 %v814_v42, %v814_v42 }
 0x1fa   : > { %1001 = vadd.xlane.f32.xlu0 %v946_v40  ;;  %977 = vadd.xlane.f32.xlu1 %v934_v41 }
 0x1fb   : > { %v1551_v43 = vpop.f32.mrb[12].mxu0  ;;  %v1575_v44 = vpop.f32.mrb[12].mxu1 }
 0x1fc   : > { %v824_v47 = vpop.f32.mrb[13].mxu0  ;;  %v904_v48 = vpop.f32.mrb[13].mxu1  ;;  %v936_v49 = vmul.f32 %v1551_v43, %v1551_v43  ;;  %v952_v61 = vmul.f32 %v1575_v44, %v1575_v44 }
 0x1fd   : > { %v935_v51 = vmul.f32 %v824_v47, %v824_v47  ;;  %v951_v2 = vmul.f32 %v904_v48, %v904_v48  ;;  %v315_v48 = vld [vmem:[%s2096_s13 + $0x18] sm:$0xff] }
 0x1fe   : > { %999 = vadd.xlane.f32.xlu0 %v945_v45  ;;  %975 = vadd.xlane.f32.xlu1 %v933_v46 }
 0x202   : > { %1005 = vadd.xlane.f32.xlu0 %v948_v19  ;;  %981 = vadd.xlane.f32.xlu1 %v936_v49 }
 0x206   : > { %1003 = vadd.xlane.f32.xlu0 %v947_v50  ;;  %979 = vadd.xlane.f32.xlu1 %v935_v51  ;;  %v1554_v52 = vpop.f32.mrb[14].mxu0 }
 0x207   : > { %v834_v53 = vpop.f32.mrb[15].mxu0  ;;  %v938_v58 = vmul.f32 %v1554_v52, %v1554_v52 }
 0x208   : > { %v937_v55 = vmul.f32 %v834_v53, %v834_v53  ;;  %v316_v53 = vld [vmem:[%s2096_s13 + $0x20] sm:$0xff] }
 0x20a   : > { %1009 = vadd.xlane.f32.xlu0 %v950_v54  ;;  %983 = vadd.xlane.f32.xlu1 %v937_v55 }
 0x20b   : > { %v1578_v56 = vpop.f32.mrb[14].mxu1 }
 0x20c   : > { %v914_v60 = vpop.f32.mrb[15].mxu1  ;;  %v954_v1 = vmul.f32 %v1578_v56, %v1578_v56 }
 0x20d   : > { %v953_v3 = vmul.f32 %v914_v60, %v914_v60 }
 0x20e   : > { %1007 = vadd.xlane.f32.xlu0 %v949_v57  ;;  %985 = vadd.xlane.f32.xlu1 %v938_v58 }
 0x212   : > { %1013 = vadd.xlane.f32.xlu0 %v952_v61 }
 0x216   : > { %1011 = vadd.xlane.f32.xlu0 %v951_v2  ;;  %v296_v2 = vld [vmem:[%s2124_s16] sm:$0xff] }
 0x21a   : > { %1015 = vadd.xlane.f32.xlu0 %v953_v3 }
 0x21c   : > { %v958_v4 = vpop.xlane.xlu1 %957 }
 0x21d   : > { %v956_v8 = vpop.xlane.xlu0 %955  ;;  %v1020_v15 = vadd.f32 1.0, %v958_v4 }
 0x21e   : > { %1017 = vadd.xlane.f32.xlu0 %v954_v1  ;;  %v1019_v13 = vadd.f32 1.0, %v956_v8 }
 0x239   : > { %v962_v6 = vpop.xlane.xlu1 %961 }
 0x23a   : > { %v2088_v24 = vadd.f32 1.0, %v962_v6  ;;  %v297_v6 = vld [vmem:[%s2124_s16 + $0x8] sm:$0xff] }
 0x23d   : > { %v960_v63 = vpop.xlane.xlu1 %959 }
 0x23e   : > { %v1021_v21 = vadd.f32 1.0, %v960_v63 }
 0x241   : > { %v966_v7 = vpop.xlane.xlu1 %965 }
 0x242   : > { %v2110_v41 = vadd.f32 1.0, %v966_v7 }
 0x245   : > { %v964_v0 = vpop.xlane.xlu1 %963 }
 0x246   : > { %v2103_v33 = vadd.f32 1.0, %v964_v0  ;;  %v298_v0 = vld [vmem:[%s2124_s16 + $0x10] sm:$0xff] }
 0x249   : > { %v970_v11 = vpop.xlane.xlu1 %969 }
 0x24a   : > { %v2126_v51 = vadd.f32 1.0, %v970_v11  ;;  %v317_v11 = vld [vmem:[%s2096_s13 + $0x28] sm:$0xff] }
 0x24d   : > { %v968_v10 = vpop.xlane.xlu1 %967 }
 0x24e   : > { %v2133_v60 = vadd.f32 1.0, %v968_v10 }
 0x251   : > { %v2090_v25 = vpop.xlane.xlu1 %973 }
 0x255   : > { %v2107_v36 = vpop.xlane.xlu1 %971 }
 0x26f   : > { %v990_v9 = vpop.xlane.xlu0 %989 }
 0x270   : > { %v1036_v59 = vadd.f32 1.0, %v990_v9 }
 0x272   : > { %v1157_v18 = vadd.f32 %v1036_v59, %v1020_v15  ;;  %vm1052_vm1 = vcmp.gt.f32.partialorder %v1020_v15, %v1036_v59 }
 0x273   : > { %v988_v5 = vpop.xlane.xlu0 %987  ;;  %v1434_v32 = vsel %vm1052_vm1, 1.0, %v1705_v62 }
 0x274   : > { %v1035_v12 = vadd.f32 1.0, %v988_v5  ;;  %v1100_v40 = vmul.f32 %v1434_v32, %v313_v31  ;;  %v299_v32 = vld [vmem:[%s2124_s16 + $0x18] sm:$0xff] }
 0x276   : > { %v1156_v16 = vadd.f32 %v1035_v12, %v1019_v13  ;;  %vm1051_vm0 = vcmp.gt.f32.partialorder %v1019_v13, %v1035_v12  ;;  %v1117_v52 = vsel %vm1115_vm3, %v1100_v40, 0.0 }
 0x277   : > { %v994_v14 = vpop.xlane.xlu0 %993  ;;  %v1433_v30 = vsel %vm1051_vm0, 1.0, %v1705_v62 }
 0x278   : > { %v1038_v22 = vadd.f32 1.0, %v994_v14  ;;  %1662 = vrcp.f32 %v1156_v16  ;;  %v1099_v37 = vmul.f32 %v1433_v30, %v312_v29 }
 0x279   : > { %1664 = vrcp.f32 %v1157_v18  ;;  %v318_v18 = vld [vmem:[%s2096_s13 + $0x30] sm:$0xff] }
 0x27a   : > { %v1159_v28 = vadd.f32 %v1038_v22, %v2088_v24  ;;  %vm1054_vm4 = vcmp.gt.f32.partialorder %v2088_v24, %v1038_v22  ;;  %v1116_v47 = vsel %vm1115_vm3, %v1099_v37, 0.0  ;;  %v300_v37 = vld [vmem:[%s2124_s16 + $0x20] sm:$0xff] }
 0x27b   : > { %v992_v20 = vpop.xlane.xlu0 %991  ;;  %v1436_v19 = vsel %vm1054_vm4, 1.0, %v1705_v62  ;;  %v1118_v3 = vadd.f32 %v1117_v52, %v1116_v47  ;;  %v319_v47 = vld [vmem:[%s2096_s13 + $0x38] sm:$0xff] }
 0x27c   : > { %v1037_v23 = vadd.f32 1.0, %v992_v20  ;;  %v1102_v1 = vmul.f32 %v1436_v19, %v315_v48  ;;  %v320_v19 = vld [vmem:[%s2096_s13 + $0x40] sm:$0xff] }
 0x27e   : > { %v1158_v26 = vadd.f32 %v1037_v23, %v1021_v21  ;;  %vm1053_vm2 = vcmp.gt.f32.partialorder %v1021_v21, %v1037_v23  ;;  %v1121_v16 = vsel %vm1115_vm3, %v1102_v1, 0.0 }
 0x27f   : > { %v998_v27 = vpop.xlane.xlu0 %997  ;;  %v1435_v34 = vsel %vm1053_vm2, 1.0, %v1705_v62 }
 0x280   : > { %1666 = vrcp.f32 %v1158_v26  ;;  %v1040_v38 = vadd.f32 1.0, %v998_v27  ;;  %v1101_v42 = vmul.f32 %v1435_v34, %v314_v17  ;;  %v2156_v34 = vadd.f32 1.0, %v2090_v25 }
 0x281   : > { %1668 = vrcp.f32 %v1159_v28 }
 0x282   : > { %v1663_v44 = vpop.eup %1662  ;;  %v1161_v49 = vadd.f32 %v1040_v38, %v2110_v41  ;;  %v1119_v57 = vsel %vm1115_vm3, %v1101_v42, 0.0  ;;  %vm1056_vm6 = vcmp.gt.f32.partialorder %v2110_v41, %v1040_v38 }
 0x283   : > { %v996_v35 = vpop.xlane.xlu0 %995  ;;  %v1665_v46 = vpop.eup %1664  ;;  %v1188_v56 = vmul.f32 %v1663_v44, %v1019_v13  ;;  %v1120_v9 = vadd.f32 %v1119_v57, %v1118_v3  ;;  %v1438_v5 = vsel %vm1056_vm6, 1.0, %v1705_v62 }
 0x284   : > { %v1039_v39 = vadd.f32 1.0, %v996_v35  ;;  %v1189_v61 = vmul.f32 %v1665_v46, %v1020_v15  ;;  %v1104_v23 = vmul.f32 %v1438_v5, %v317_v11  ;;  %v2159_v35 = vadd.f32 1.0, %v2107_v36 }
 0x285   : > { %v1204_v59 = vmul.f32 %v1188_v56, %v296_v2  ;;  %v1122_v28 = vadd.f32 %v1121_v16, %v1120_v9 }
 0x286   : > { %vm1055_vm5 = vcmp.gt.f32.partialorder %v2103_v33, %v1039_v39  ;;  %v1160_v43 = vadd.f32 %v1039_v39, %v2103_v33  ;;  %v1205_v10 = vmul.f32 %v1189_v61, %v297_v6 }
 0x287   : > { %v1002_v45 = vpop.xlane.xlu0 %1001  ;;  %v2118_v50 = vpop.xlane.xlu1 %977  ;;  %v1437_v54 = vsel %vm1055_vm5, 1.0, %v1705_v62  ;;  %v1220_v31 = vsel %vm1115_vm3, %v1204_v59, 0.0 }
 0x288   : > { %1670 = vrcp.f32 %v1160_v43  ;;  %v1042_v58 = vadd.f32 1.0, %v1002_v45  ;;  %v1103_v7 = vmul.f32 %v1437_v54, %v316_v53  ;;  %v1221_v40 = vsel %vm1115_vm3, %v1205_v10, 0.0 }
 0x289   : > { %1672 = vrcp.f32 %v1161_v49  ;;  %v1125_v43 = vsel %vm1115_vm3, %v1104_v23, 0.0  ;;  %v1222_v46 = vadd.f32 %v1221_v40, %v1220_v31  ;;  %v303_v31 = vld [vmem:[%s2124_s16 + $0x38] sm:$0xff] }
 0x28a   : > { %v1667_v55 = vpop.eup %1666  ;;  %v1163_v13 = vadd.f32 %v1042_v58, %v2126_v51  ;;  %v1123_v26 = vsel %vm1115_vm3, %v1103_v7, 0.0  ;;  %vm1058_vm8 = vcmp.gt.f32.partialorder %v2126_v51, %v1042_v58 }
 0x28b   : > { %v1000_v4 = vpop.xlane.xlu0 %999  ;;  %v1190_v63 = vmul.f32 %v1667_v55, %v1021_v21  ;;  %v1669_v12 = vpop.eup %1668  ;;  %v1440_v36 = vsel %vm1058_vm8, 1.0, %v1705_v62 }
 0x28c   : > { %v1041_v8 = vadd.f32 1.0, %v1000_v4  ;;  %v2143_v14 = vpop.xlane.xlu1 %975  ;;  %v1191_v27 = vmul.f32 %v1669_v12, %v2088_v24  ;;  %v1124_v24 = vadd.f32 %v1123_v26, %v1122_v28  ;;  %v1106_v58 = vmul.f32 %v1440_v36, %v319_v47  ;;  %v302_v12 = vld [vmem:[%s2124_s16 + $0x30] sm:$0xff] }
 0x28d   : > { %v1206_v22 = vmul.f32 %v1190_v63, %v298_v0  ;;  %v301_v63 = vld [vmem:[%s2124_s16 + $0x28] sm:$0xff]  ;;  %v2189_v5 = vadd.f32 1.0, %v2143_v14  ;;  %v322_v26 = vld [vmem:[%s2096_s13 + $0x50] sm:$0xff] }
 0x28e   : > { %vm1057_vm7 = vcmp.gt.f32.partialorder %v2133_v60, %v1041_v8  ;;  %v1162_v15 = vadd.f32 %v1041_v8, %v2133_v60  ;;  %v1207_v25 = vmul.f32 %v1191_v27, %v299_v32  ;;  %v1126_v55 = vadd.f32 %v1125_v43, %v1124_v24  ;;  %v321_v0 = vld [vmem:[%s2096_s13 + $0x48] sm:$0xff] }
 0x28f   : > { %v1439_v20 = vsel %vm1057_vm7, 1.0, %v1705_v62  ;;  %v1006_v21 = vpop.xlane.xlu0 %1005  ;;  %v1223_v42 = vsel %vm1115_vm3, %v1206_v22, 0.0  ;;  %v2182_v8 = vadd.f32 1.0, %v2118_v50  ;;  %v1129_v10 = vsel %vm1115_vm3, %v1106_v58, 0.0 }
 0x290   : > { %1674 = vrcp.f32 %v1162_v15  ;;  %v1044_v29 = vadd.f32 1.0, %v1006_v21  ;;  %v1105_v17 = vmul.f32 %v1439_v20, %v318_v18  ;;  %v982_v44 = vpop.xlane.xlu1 %981  ;;  %v1224_v54 = vadd.f32 %v1223_v42, %v1222_v46 }
 0x291   : > { %1676 = vrcp.f32 %v1163_v13  ;;  %v1225_v6 = vsel %vm1115_vm3, %v1207_v25, 0.0  ;;  %v2203_v32 = vadd.f32 1.0, %v982_v44 }
 0x292   : > { %v1671_v30 = vpop.eup %1670  ;;  %v1165_v48 = vadd.f32 %v1044_v29, %v2156_v34  ;;  %v1127_v52 = vsel %vm1115_vm3, %v1105_v17, 0.0  ;;  %vm1060_vm10 = vcmp.gt.f32.partialorder %v2156_v34, %v1044_v29 }
 0x293   : > { %v1192_v38 = vmul.f32 %v1671_v30, %v2103_v33  ;;  %v1004_v39 = vpop.xlane.xlu0 %1003  ;;  %v1673_v33 = vpop.eup %1672  ;;  %v1128_v3 = vadd.f32 %v1127_v52, %v1126_v55  ;;  %v1442_v9 = vsel %vm1060_vm10, 1.0, %v1705_v62 }
 0x294   : > { %v1043_v45 = vadd.f32 1.0, %v1004_v39  ;;  %v1193_v2 = vmul.f32 %v1673_v33, %v2110_v41  ;;  %v980_v11 = vpop.xlane.xlu1 %979  ;;  %v1226_v41 = vadd.f32 %v1225_v6, %v1224_v54  ;;  %v1108_v22 = vmul.f32 %v1442_v9, %v321_v0 }
 0x295   : > { %v1208_v49 = vmul.f32 %v1192_v38, %v300_v37  ;;  %v1130_v23 = vadd.f32 %v1129_v10, %v1128_v3  ;;  %v2207_v40 = vadd.f32 1.0, %v980_v11 }
 0x296   : > { %vm1059_vm9 = vcmp.gt.f32.partialorder %v2159_v35, %v1043_v45  ;;  %v1164_v53 = vadd.f32 %v1043_v45, %v2159_v35  ;;  %v1209_v20 = vmul.f32 %v1193_v2, %v301_v63  ;;  %v1133_v39 = vsel %vm1115_vm3, %v1108_v22, 0.0  ;;  %v304_v45 = vld [vmem:[%s2124_s16 + $0x40] sm:$0xff] }
 0x297   : > { %v1441_v56 = vsel %vm1059_vm9, 1.0, %v1705_v62  ;;  %v1010_v57 = vpop.xlane.xlu0 %1009  ;;  %v1227_v7 = vsel %vm1115_vm3, %v1208_v49, 0.0 }
 0x298   : > { %v1107_v61 = vmul.f32 %v1441_v56, %v320_v19  ;;  %1678 = vrcp.f32 %v1164_v53  ;;  %v1046_v1 = vadd.f32 1.0, %v1010_v57  ;;  %v1228_v21 = vadd.f32 %v1227_v7, %v1226_v41  ;;  %v984_v17 = vpop.xlane.xlu1 %983  ;;  %v325_v53 = vld [vmem:[%s2096_s13 + $0x68] sm:$0xff] }
 0x299   : > { %1680 = vrcp.f32 %v1165_v48  ;;  %v1229_v38 = vsel %vm1115_vm3, %v1209_v20, 0.0  ;;  %v1033_v6 = vadd.f32 1.0, %v984_v17 }
 0x29a   : > { %v1675_v4 = vpop.eup %1674  ;;  %v1131_v50 = vsel %vm1115_vm3, %v1107_v61, 0.0  ;;  %v1167_v16 = vadd.f32 %v1046_v1, %v2182_v8  ;;  %vm1062_vm11 = vcmp.gt.f32.partialorder %v2182_v8, %v1046_v1  ;;  %v1230_v48 = vadd.f32 %v1229_v38, %v1228_v21  ;;  %v324_v61 = vld [vmem:[%s2096_s13 + $0x60] sm:$0xff]  ;;  %v306_v21 = vld [vmem:[%s2124_s16 + $0x50] sm:$0xff] }
 0x29b   : > { %v1194_v59 = vmul.f32 %v1675_v4, %v2133_v60  ;;  %v1008_v13 = vpop.xlane.xlu0 %1007  ;;  %v1677_v15 = vpop.eup %1676  ;;  %v1132_v28 = vadd.f32 %v1131_v50, %v1130_v23  ;;  %v1444_v42 = vsel %vm1062_vm11, 1.0, %v1705_v62  ;;  %v305_v4 = vld [vmem:[%s2124_s16 + $0x48] sm:$0xff] }
 0x29c   : > { %v1045_v18 = vadd.f32 1.0, %v1008_v13  ;;  %v1195_v27 = vmul.f32 %v1677_v15, %v2126_v51  ;;  %1682 = vrcp.f32 %v1167_v16  ;;  %v323_v51 = vld [vmem:[%s2096_s13 + $0x58] sm:$0xff]  ;;  %v986_v3 = vpop.xlane.xlu1 %985  ;;  %v326_v13 = vld [vmem:[%s2096_s13 + $0x70] sm:$0xff] }
 0x29d   : > { %v1210_v14 = vmul.f32 %v1194_v59, %v302_v12  ;;  %v1134_v33 = vadd.f32 %v1133_v39, %v1132_v28  ;;  %v1110_v52 = vmul.f32 %v1444_v42, %v323_v51  ;;  %v1034_v12 = vadd.f32 1.0, %v986_v3  ;;  %v307_v39 = vld [vmem:[%s2124_s16 + $0x58] sm:$0xff] }
 0x29e   : > { %vm1061_vm12 = vcmp.gt.f32.partialorder %v2189_v5, %v1045_v18  ;;  %v1166_v60 = vadd.f32 %v1045_v18, %v2189_v5  ;;  %v1211_v36 = vmul.f32 %v1195_v27, %v303_v31  ;;  %v327_v31 = vld [vmem:[%s2096_s13 + $0x78] sm:$0xff] }
 0x29f   : > { %v1443_v29 = vsel %vm1061_vm12, 1.0, %v1705_v62  ;;  %v1014_v30 = vpop.xlane.xlu0 %1013  ;;  %v1231_v44 = vsel %vm1115_vm3, %v1210_v14, 0.0  ;;  %v1137_v9 = vsel %vm1115_vm3, %v1110_v52, 0.0 }
 0x2a0   : > { %v1109_v37 = vmul.f32 %v1443_v29, %v322_v26  ;;  %1684 = vrcp.f32 %v1166_v60  ;;  %v1048_v24 = vadd.f32 1.0, %v1014_v30  ;;  %v1232_v56 = vadd.f32 %v1231_v44, %v1230_v48  ;;  %v308_v48 = vld [vmem:[%s2124_s16 + $0x60] sm:$0xff] }
 0x2a1   : > { %v1233_v1 = vsel %vm1115_vm3, %v1211_v36, 0.0 }
 0x2a2   : > { %v1679_v43 = vpop.eup %1678  ;;  %v1135_v46 = vsel %vm1115_vm3, %v1109_v37, 0.0  ;;  %vm1064_vm13 = vcmp.gt.f32.partialorder %v2203_v32, %v1048_v24  ;;  %v1169_v25 = vadd.f32 %v1048_v24, %v2203_v32  ;;  %v1234_v15 = vadd.f32 %v1233_v1, %v1232_v56  ;;  %v310_v56 = vld [vmem:[%s2124_s16 + $0x70] sm:$0xff]  ;;  %v311_v1 = vld [vmem:[%s2124_s16 + $0x78] sm:$0xff] }
 0x2a3   : > { %v1681_v47 = vpop.eup %1680  ;;  %v1196_v19 = vmul.f32 %v1679_v43, %v2159_v35  ;;  %v1012_v49 = vpop.xlane.xlu0 %1011  ;;  %v1446_v54 = vsel %vm1064_vm13, 1.0, %v1705_v62  ;;  %v1136_v58 = vadd.f32 %v1135_v46, %v1134_v33 }
 0x2a4   : > { %1686 = vrcp.f32 %v1169_v25  ;;  %v1047_v55 = vadd.f32 1.0, %v1012_v49  ;;  %v1197_v2 = vmul.f32 %v1681_v47, %v2156_v34  ;;  %v1112_v63 = vmul.f32 %v1446_v54, %v325_v53 }
 0x2a5   : > { %v1212_v57 = vmul.f32 %v1196_v19, %v304_v45  ;;  %v1138_v59 = vadd.f32 %v1137_v9, %v1136_v58  ;;  %v309_v19 = vld [vmem:[%s2124_s16 + $0x68] sm:$0xff] }
 0x2a6   : > { %vm1063_vm14 = vcmp.gt.f32.partialorder %v2207_v40, %v1047_v55  ;;  %v1168_v35 = vadd.f32 %v1047_v55, %v2207_v40  ;;  %v1683_v41 = vpop.eup %1682  ;;  %v1213_v16 = vmul.f32 %v1197_v2, %v305_v4  ;;  %v1141_v23 = vsel %vm1115_vm3, %v1112_v63, 0.0 }
 0x2a7   : > { %v1445_v7 = vsel %vm1063_vm14, 1.0, %v1705_v62  ;;  %v1016_v0 = vpop.xlane.xlu0 %1015  ;;  %v1235_v10 = vsel %vm1115_vm3, %v1212_v57, 0.0  ;;  %v1199_v30 = vmul.f32 %v1683_v41, %v2182_v8 }
 0x2a8   : > { %v1111_v11 = vmul.f32 %v1445_v7, %v324_v61  ;;  %1688 = vrcp.f32 %v1168_v35  ;;  %v1049_v34 = vadd.f32 1.0, %v1016_v0  ;;  %v1236_v29 = vadd.f32 %v1235_v10, %v1234_v15 }
 0x2a9   : > { %v1237_v42 = vsel %vm1115_vm3, %v1213_v16, 0.0  ;;  %v1215_v25 = vmul.f32 %v1199_v30, %v307_v39 }
 0x2aa   : > { %v1685_v50 = vpop.eup %1684  ;;  %v1139_v18 = vsel %vm1115_vm3, %v1111_v11, 0.0  ;;  %vm1065_vm15 = vcmp.gt.f32.partialorder %v1033_v6, %v1049_v34  ;;  %v1170_v20 = vadd.f32 %v1049_v34, %v1033_v6  ;;  %v1238_v8 = vadd.f32 %v1237_v42, %v1236_v29 }
 0x2ab   : > { %v1198_v22 = vmul.f32 %v1685_v50, %v2189_v5  ;;  %v1140_v26 = vadd.f32 %v1139_v18, %v1138_v59  ;;  %v1447_v14 = vsel %vm1065_vm15, 1.0, %v1705_v62  ;;  %v1018_v60 = vpop.xlane.xlu0 %1017  ;;  %v1241_v54 = vsel %vm1115_vm3, %v1215_v25, 0.0 }
 0x2ac   : > { %v1113_v27 = vmul.f32 %v1447_v14, %v326_v13  ;;  %1690 = vrcp.f32 %v1170_v20  ;;  %v1050_v28 = vadd.f32 1.0, %v1018_v60 }
 0x2ad   : > { %v1142_v17 = vadd.f32 %v1141_v23, %v1140_v26  ;;  %v1214_v37 = vmul.f32 %v1198_v22, %v306_v21 }
 0x2ae   : > { %v1687_v24 = vpop.eup %1686  ;;  %v1143_v5 = vsel %vm1115_vm3, %v1113_v27, 0.0  ;;  %vm1066_vm0 = vcmp.gt.f32.partialorder %v1034_v12, %v1050_v28  ;;  %v1171_v38 = vadd.f32 %v1050_v28, %v1034_v12 }
 0x2af   : > { %v1448_v51 = vsel %vm1066_vm0, 1.0, %v1705_v62  ;;  %v1239_v43 = vsel %vm1115_vm3, %v1214_v37, 0.0  ;;  %v1144_v45 = vadd.f32 %v1143_v5, %v1142_v17  ;;  %v1201_v46 = vmul.f32 %v1687_v24, %v2203_v32 }
 0x2b0   : > { %v1114_v44 = vmul.f32 %v1448_v51, %v327_v31  ;;  %1692 = vrcp.f32 %v1171_v38  ;;  %v1240_v33 = vadd.f32 %v1239_v43, %v1238_v8 }
 0x2b1   : > { %v1217_v53 = vmul.f32 %v1201_v46, %v309_v19 }
 0x2b2   : > { %v1689_v47 = vpop.eup %1688  ;;  %v1145_v36 = vsel %vm1115_vm3, %v1114_v44, 0.0  ;;  %v1242_v57 = vadd.f32 %v1241_v54, %v1240_v33 }
 0x2b3   : > { %v1146_v62 = vadd.f32 %v1145_v36, %v1144_v45  ;;  %v1200_v49 = vmul.f32 %v1689_v47, %v2207_v40  ;;  %v1245_v3 = vsel %vm1115_vm3, %v1217_v53, 0.0 }
 0x2b5   : > { %1147 = vadd.xlane.f32.xlu1 %v1146_v62  ;;  %v1216_v52 = vmul.f32 %v1200_v49, %v308_v48 }
 0x2b6   : > { %v1691_v55 = vpop.eup %1690 }
 0x2b7   : > { %v1202_v32 = vmul.f32 %v1691_v55, %v1033_v6  ;;  %v1243_v58 = vsel %vm1115_vm3, %v1216_v52, 0.0 }
 0x2b8   : > { %v1244_v61 = vadd.f32 %v1243_v58, %v1242_v57 }
 0x2b9   : > { %v1218_v2 = vmul.f32 %v1202_v32, %v310_v56 }
 0x2ba   : > { %v1693_v35 = vpop.eup %1692  ;;  %v1246_v4 = vadd.f32 %v1245_v3, %v1244_v61 }
 0x2bb   : > { %v1203_v63 = vmul.f32 %v1693_v35, %v1034_v12  ;;  %v1247_v40 = vsel %vm1115_vm3, %v1218_v2, 0.0 }
 0x2bc   : > { %v1248_v0 = vadd.f32 %v1247_v40, %v1246_v4 }
 0x2bd   : > { %v1219_v7 = vmul.f32 %v1203_v63, %v311_v1 }
 0x2bf   : > { %v1249_v9 = vsel %vm1115_vm3, %v1219_v7, 0.0 }
 0x2c0   : > { %v1250_v11 = vadd.f32 %v1249_v9, %v1248_v0 }
 0x2c2   : > { %1251 = vadd.xlane.f32.xlu0 %v1250_v11 }
 0x342   : > { %v1148_v34 = vpop.xlane.xlu1 %1147 }
 0x343   : > { %v1149_v6 = vrot.slane %v1148_v34, 4 }
 0x345   : > { %v1150_v41 = vadd.f32 %v1149_v6, %v1148_v34 }
 0x347   : > { %v1151_v59 = vrot.slane %v1150_v41, 2 }
 0x349   : > { %v1152_v13 = vadd.f32 %v1151_v59, %v1150_v41 }
 0x34b   : > { %v1153_v15 = vrot.slane %v1152_v13, 1 }
 0x34d   : > { %v1154_v10 = vadd.f32 %v1153_v15, %v1152_v13 }
 0x34f   : > { %v1252_v50 = vpop.xlane.xlu0 %1251  ;;  %1627 = vpush %v1154_v10 }
 0x350   : > { %v1253_v12 = vrot.slane %v1252_v50, 4 }
 0x352   : > { %v1254_v16 = vadd.f32 %v1253_v12, %v1252_v50 }
 0x354   : > { %v1255_v18 = vrot.slane %v1254_v16, 2 }
 0x356   : > { %v1256_v20 = vadd.f32 %v1255_v18, %v1254_v16 }
 0x358   : > { %v1257_v21 = vrot.slane %v1256_v20, 1 }
 0x35a   : > { %v1258_v22 = vadd.f32 %v1257_v21, %v1256_v20 }
 0x35c   : > { %1629 = vpush %v1258_v22 }
 0x380   : > { %s1628_s23 = spop %1627 }
 0x381   : > { %v1262_v23 = vstv %s1628_s23 }
 0x382   : > { %1263 = vst [vmem:[%s279_s22] sm:$0xff] %v1262_v23 }
 0x38d   : > { %s1630_s28 = spop %1629 }
 0x38e   : > { %v1260_v26 = vstv %s1630_s28 }
 0x38f   : > { %1261 = vst [vmem:[%s275_s27] sm:$0xff] %v1260_v26 }
 0x390 PF: > { %s16_s18 = sadd.s32 1, %s1700_s18  }
 0x391   : > { %p13_p5 = scmp.ge.s32.totalorder %s16_s18, 7  }
 0x393   :  { %15 = sbr.rel (!%p13_p5) target bundleno = 1 (0x1), region = 84 }

</bundles_post_ra>
